<compile_context>
chip_gen: v6e
topology: v6e:2x2x1
jax: 0.10.0
libtpu: 0.0.40
codegen_flags: <defaults>
</compile_context>

<pallas_src>
import numpy as np

import jax
import jax.numpy as jnp
from jax.experimental import pallas as pl
from jax.experimental.pallas import tpu as pltpu


def _pick_tile(dim, granule, cap=256):
    """Tile length for a trailing axis: full extent if small, else the largest
    multiple-of-`granule` divisor of `dim` that is <= cap (falling back to the
    full extent, which is always layout-legal)."""
    if dim <= cap:
        return dim
    t = (cap // granule) * granule
    while t >= granule:
        if dim % t == 0:
            return t
        t -= granule
    return dim


def swap_dims(x, dim1, dim2, *, small_fast_path=False):
    """Pallas equivalent of torch.Tensor.transpose(dim1, dim2)."""
    nd = x.ndim
    d1, d2 = dim1 % nd, dim2 % nd
    if d1 == d2:
        return x
    if d1 > d2:
        d1, d2 = d2, d1

    out_shape = list(x.shape)
    out_shape[d1], out_shape[d2] = out_shape[d2], out_shape[d1]
    out_shape = tuple(out_shape)

    perm = list(range(nd))
    perm[d1], perm[d2] = perm[d2], perm[d1]
    perm = tuple(perm)

    itemsize = jnp.dtype(x.dtype).itemsize

    # Optional tiny-tensor fast path (launch cost dominates; XLA fuses a pure
    # transpose for free).  Off by default so the Pallas kernel is exercised.
    if small_fast_path and x.size * itemsize < (256 << 10):
        return jnp.swapaxes(x, d1, d2)

    sub_g = max(8, 32 // itemsize)   # sublane granule: 8 f32 / 16 bf16 / 32 int8
    lane_g = 128

    if d2 < nd - 2:
        # ---- Case A: both swapped dims are leading -> pure-copy kernel. ----
        lead = nd - 2
        ts = _pick_tile(x.shape[nd - 2], sub_g)
        tl = _pick_tile(x.shape[nd - 1], lane_g)
        grid = tuple(x.shape[:lead]) + (x.shape[nd - 2] // ts, x.shape[nd - 1] // tl)
        in_block = (1,) * lead + (ts, tl)
        out_block = in_block

        def in_map(*idx):
            return idx

        def out_map(*idx):
            idx = list(idx)
            idx[d1], idx[d2] = idx[d2], idx[d1]
            return tuple(idx)

        def kernel(x_ref, o_ref):
            o_ref[...] = x_ref[...]

    elif d1 == nd - 2:
        # ---- Case B1: swap of the two trailing axes (H <-> W). ----
        H, W = x.shape[nd - 2], x.shape[nd - 1]
        # Tiles must be legal on BOTH sides of the transpose: full extent or a
        # multiple of 128 (which also satisfies every sublane granule).
        th = _pick_tile(H, lane_g)
        tw = _pick_tile(W, lane_g)
        lead = nd - 2
        grid = tuple(x.shape[:lead]) + (H // th, W // tw)
        in_block = (1,) * lead + (th, tw)
        out_block = (1,) * lead + (tw, th)

        def in_map(*idx):
            return idx

        def out_map(*idx):
            return idx[:lead] + (idx[lead + 1], idx[lead])

        def kernel(x_ref, o_ref):
            o_ref[...] = jnp.swapaxes(x_ref[...], -1, -2)

    else:
        # ---- Case B2: one leading dim swapped with one trailing dim. ----
        other_trail = nd - 1 if d2 == nd - 2 else nd - 2
        granule = lane_g if other_trail == nd - 1 else sub_g
        t_other = _pick_tile(x.shape[other_trail], granule)

        grid_axes = [a for a in range(nd - 2) if a != d1]
        in_block = [1] * nd
        in_block[d1] = x.shape[d1]
        in_block[d2] = x.shape[d2]
        in_block[other_trail] = t_other
        in_block = tuple(in_block)
        out_block = tuple(in_block[p] for p in perm)

        grid = tuple(x.shape[a] for a in grid_axes) + (x.shape[other_trail] // t_other,)
        pos_of = {a: i for i, a in enumerate(grid_axes)}
        n_lead_grid = len(grid_axes)

        def idx_map(*idx):
            out = []
            for a in range(nd):
                if a in pos_of:
                    out.append(idx[pos_of[a]])
                elif a == other_trail:
                    out.append(idx[n_lead_grid])
                else:
                    out.append(0)
            return tuple(out)

        in_map = idx_map
        out_map = idx_map

        def kernel(x_ref, o_ref):
            o_ref[...] = jnp.transpose(x_ref[...], perm)

    # VMEM budget (input + output, double-buffered).  Only raise the scoped
    # limit when a full-extent block actually needs it; cap well under the
    # 64 MiB physical VMEM of v7x.
    buf_bytes = 2 * (int(np.prod(in_block)) + int(np.prod(out_block))) * itemsize
    ckw = dict(dimension_semantics=("parallel",) * len(grid))
    if buf_bytes > (12 << 20):
        ckw["vmem_limit_bytes"] = int(min(buf_bytes + (4 << 20), 48 << 20))

    cost = pl.CostEstimate(
        flops=0, transcendentals=0, bytes_accessed=2 * x.size * itemsize
    )

    return pl.pallas_call(
        kernel,
        out_shape=jax.ShapeDtypeStruct(out_shape, x.dtype),
        grid=grid,
        in_specs=[pl.BlockSpec(in_block, in_map)],
        out_specs=pl.BlockSpec(out_block, out_map),
        compiler_params=pltpu.CompilerParams(**ckw),
        cost_estimate=cost,
    )(x)


if __name__ == "__main__":
    key = jax.random.PRNGKey(0)
    x = jax.random.normal(key, (2, 4, 16, 16), dtype=jnp.float32)

    # Case B1: SwapDims(2, 3) — trailing-dim (H <-> W) tiled transpose.
    out = jax.block_until_ready(swap_dims(x, 2, 3))
    np.testing.assert_array_equal(np.asarray(out), np.asarray(jnp.swapaxes(x, 2, 3)))
    assert out.shape == (2, 4, 16, 16)

    # Case A: SwapDims(0, 1) — pure-copy kernel, swap via output index_map only.
    out2 = jax.block_until_ready(swap_dims(x, 0, 1))
    np.testing.assert_array_equal(np.asarray(out2), np.asarray(jnp.swapaxes(x, 0, 1)))
    assert out2.shape == (4, 2, 16, 16)

    # Case B2: SwapDims(1, 2) — leading dim swapped with a trailing dim.
    out3 = jax.block_until_ready(swap_dims(x, 1, 2))
    np.testing.assert_array_equal(np.asarray(out3), np.asarray(jnp.swapaxes(x, 1, 2)))
    assert out3.shape == (2, 16, 4, 16)

    print("KERNEL_OK")
</pallas_src>

<mosaic_0001>
module attributes {stable_mosaic.version = 11 : i64} {
  func.func @kernel(%arg0: i32, %arg1: i32, %arg2: i32, %arg3: i32, %arg4: memref<1x1x16x16xf32, #tpu.memory_space<vmem>>, %arg5: memref<1x1x16x16xf32, #tpu.memory_space<vmem>>) attributes {dimension_semantics = [#tpu.dimension_semantics<parallel>, #tpu.dimension_semantics<parallel>, #tpu.dimension_semantics<parallel>, #tpu.dimension_semantics<parallel>], iteration_bounds = array<i64: 2, 4, 1, 1>, scalar_prefetch = 0 : i64, scratch_operands = 0 : i64, tpu.core_type = #tpu.core_type<tc>, window_params = [{transform_indices = @transform_0, window_bounds = array<i64: 1, 1, 16, 16>}, {transform_indices = @transform_1, window_bounds = array<i64: 1, 1, 16, 16>}]} {
    %c0 = arith.constant 0 : index
    %c0_0 = arith.constant 0 : index
    %c0_1 = arith.constant 0 : index
    %c0_2 = arith.constant 0 : index
    %0 = vector.load %arg4[%c0, %c0_0, %c0_1, %c0_2] : memref<1x1x16x16xf32, #tpu.memory_space<vmem>>, vector<1x1x16x16xf32>
    %1 = tpu.transpose %0, [0, 1, 3, 2] : vector<1x1x16x16xf32> -> vector<1x1x16x16xf32>
    %c0_3 = arith.constant 0 : index
    %c0_4 = arith.constant 0 : index
    %c0_5 = arith.constant 0 : index
    %c0_6 = arith.constant 0 : index
    %2 = vector.load %arg5[%c0_3, %c0_4, %c0_5, %c0_6] : memref<1x1x16x16xf32, #tpu.memory_space<vmem>>, vector<1x1x16x16xf32>
    tpu.vector_store %arg5[%c0_3, %c0_4, %c0_5, %c0_6], %1 {strides = array<i32>} : memref<1x1x16x16xf32, #tpu.memory_space<vmem>>, vector<1x1x16x16xf32>,
    return
  }
  func.func @transform_0(%arg0: i32, %arg1: i32, %arg2: i32, %arg3: i32) -> (i32, i32, i32, i32) {
    %c0_i32 = arith.constant 0 : i32
    return %arg0, %arg1, %arg2, %arg3 : i32, i32, i32, i32
  }
  func.func @transform_1(%arg0: i32, %arg1: i32, %arg2: i32, %arg3: i32) -> (i32, i32, i32, i32) {
    %c0_i32 = arith.constant 0 : i32
    return %arg0, %arg1, %arg3, %arg2 : i32, i32, i32, i32
  }
}

</mosaic_0001>

<bundles_post_ra>
// kernel: tpu_custom_call.1
= control target key start
LH: loop header
LB: loop body
LE: loop exit
PB: predicated region body
PF: predicated region fallthrough
CT: control target
= control target key end

     0   :  { %6 = vsyncpa [#allocation3], 0  ;;  %s746_s0 = inlined_call_operand.hbm [shape: f32[2,4,16,16], index: 0, kind: input, shape index: {}]   ;;  %s747_s1 = inlined_call_operand.hbm [shape: f32[2,4,16,16], index: 1, kind: output, shape index: {}]  }
   0x1   :  { %8 = vsyncpa [#allocation3 + $0x1], 0 }
   0x2   :  { %9 = vsyncpa [#allocation4], 0 }
   0x3   :  { %11 = vsyncpa [#allocation4 + $0x1], 0  ;;  %s580_s6 = smov 0   ;;  %s582_s7 = smov 0  }
   0x4   :  { %s584_s8 = smov 0   ;;  %s586_s9 = smov 0  }
   0x5   :  { %s588_s10 = smov 0   ;;  %s590_s11 = smov 0  }
   0x6   :  { %s592_s12 = smov 0   ;;  %s594_s13 = smov 0  }
   0x7 LB: > { %s338_s14 = sadd.s32 4294967295, %s562_s13   ;;  %s339_s15 = sadd.s32 4294967294, %s562_s13   ;;  %s562_s13 = sphi %s594_s13, %s17_s13   ;;  %s558_s12 = sphi %s592_s12, %s759_s12   ;;  %s554_s11 = sphi %s590_s11, %s758_s11   ;;  %s550_s10 = sphi %s588_s10, %s757_s10   ;;  %s546_s9 = sphi %s586_s9, %s756_s9   ;;  %s542_s8 = sphi %s584_s8, %s755_s8   ;;  %s538_s7 = sphi %s582_s7, %s754_s7   ;;  %s534_s6 = sphi %s580_s6, %s753_s6  }
   0x8   : > { %s39_s16 = sadd.s32 1, %s554_s11  ;;  %s43_s17 = sadd.s32 1, %s558_s12 }
   0x9   : > { %p41_p0 = scmp.ge.s32.totalorder %s39_s16, 4  ;;  %s56_s18 = sadd.s32 1, %s542_s8 }
   0xa   : > { %p63_p1 = scmp.ne.s32.totalorder %s542_s8, %s538_s7  ;;  %p64_p2 = scmp.eq.s32.totalorder %s562_s13, 0 }
   0xb   : > { %s761_s16 = smov (%p41_p0, %s39_s16), 0  ;;  %s763_s17 = smov (!%p41_p0, %s43_s17), %s558_s12 }
   0xc   : > { %s48_s19 = ssub.s32 %s554_s11, %s761_s16  ;;  %p633_p3 = por %p64_p2, %p63_p1 }
   0xd   : > { %p45_p4 = scmp.ge.s32.totalorder %s763_s17, 2  ;;  %p69_p5 = scmp.ne.s32.totalorder %s538_s7, %s534_s6 }
   0xe   : > { %p70_p6 = scmp.eq.s32.totalorder %s338_s14, 0  ;;  %p99_p7 = scmp.eq.s32.totalorder %s338_s14, 7 }
   0xf   : > { %s765_s17 = smov (%p45_p4, %s763_s17), 0  ;;  %p105_p10 = scmp.eq.s32.totalorder %s339_s15, 7 }
  0x10   : > { %p641_p8 = por %p70_p6, %p69_p5  ;;  %p645_p9 = por %p99_p7, %p63_p1 }
  0x11   : > { %s47_s23 = ssub.s32 %s558_s12, %s765_s17  ;;  %p651_p12 = por %p105_p10, %p69_p5 }
  0x12   : > { %s49_s24 = sor.u32 %s48_s19, %s47_s23  ;;  %p367_p13 = scmp.lt.s32.totalorder %s562_s13, 8 }
  0x13   : > { %p54_p11 = scmp.eq.s32.totalorder %s49_s24, 0  ;;  %s125_s26 = sand.u32 1, %s542_s8  }
  0x14   : > { %s342_s28 = sshll.u32 %s125_s26, 4  ;;  %s343_s29 = sshll.u32 %s554_s11, 1 }
  0x15   : > { %s658_s27 = scalar_select %p54_p11, %s542_s8, %s56_s18  }
  0x16   : > { %s344_s30 = sshll.u32 %s558_s12, 3  ;;  %s129_s2 = scalar_lea.vmem [#allocation2], %s342_s28 }
  0x17   : > { %s141_s3 = sshll.u32 %s129_s2, 4  ;;  %s138_s4 = sadd.s32 %s344_s30, %s343_s29  ;;  %s142_s3 = int_to_ptr.vmem [resolvable:$true] %s141_s3 }
  0x18   : > { %s345_s5 = sshll.u32 %s138_s4, 7  ;;  %p664_p0 = pnand %p367_p13, %p633_p3 }
  0x19   : > { %s140_s23 = scalar_lea.hbm %s746_s0, %s345_s5  ;;  %s126_s18 = scalar_lea.sflag [#allocation3], %s125_s26 }
  0x1a   : > { %p440_p1 = pneg %p664_p0  ;;  %s451_s24 = scalar_lea.vmem %s142_s3, 256 }
  0x1b   : > { %p452_p2 = scmp.ne.s32.totalorder %s142_s3, %s451_s24  ;;  %s564_s28 = smov [#allocation2]  }
  0x1c   : > { %s456_s29 = sshll.u32 %s564_s28, 4  ;;  %s457_s29 = int_to_ptr.vmem [resolvable:$false] %s456_s29 }
  0x1d   : > { %p454_p4 = pnand %p452_p2, %p440_p1  ;;  %s458_s20 = scalar_lea.vmem %s457_s29, 512 }
  0x1e   : > { %p459_p3 = scmp.lt.s32.totalorder %s142_s3, %s457_s29  ;;  %p460_p6 = scmp.lt.s32.totalorder %s458_s20, %s451_s24 }
  0x1f   : > { %p455_p5 = pneg %p454_p4 }
  0x20   : > { %p461_p7 = por %p460_p6, %p459_p3 }
  0x22   : > { %p462_p10 = pnand %p461_p7, %p455_p5 }
  0x24   : > { %465 = shalt.err (!%p462_p10)
}
  0x25   : > { %s565_s30 = smov 128   ;;  %s566_s26 = smov 8  }
  0x26   : > { %362 = dma.hbm_to_vmem [thread:$0]  (!%p664_p0), %s140_s23, 256, %s142_s3, %s126_s18, %s565_s30, %s565_s30, %s566_s26  }
  0x27   : > { %p346_p11 = scmp.ge.s32.totalorder %s562_s13, 1  ;;  %p149_p13 = scmp.lt.s32.totalorder %s562_s13, 9 }
  0x29   : > { %p150_p1 = pnand %p346_p11, %p149_p13 }
  0x2a   : > { %s678_s2 = sand.u32 (!%p150_p1), 1, %s538_s7  }
  0x2b   : > { %153 = sbr.rel (%p150_p1) target bundleno = 193 (0xc1), region = 24  ;;  %s347_s4 = sshll.u32 (!%p150_p1), %s678_s2, 4 }
  0x2c   : > { %s156_s5 = scalar_lea.sflag (!%p150_p1), [#allocation3], %s678_s2  ;;  %s159_s15 = scalar_lea.vmem (!%p150_p1), [#allocation2], %s347_s4 }
  0x30   : > { %525 = dma.done.wait (%p641_p8), %s156_s5, 256  }
  0x31   : > { %527 = vsyncadd (%p641_p8), %s156_s5, 4294967040  ;;  %v180_v0 = vld [vmem:[%s159_s15] sm:$0xff]  ;;  %v181_v1 = vld [vmem:[%s159_s15 + $0x8] sm:$0xff]  ;;  %s350_s3 = sshll.u32 %s546_s9, 1  ;;  %s351_s14 = sshll.u32 %s550_s10, 3  ;;  %vm214_vm0 = vcmask 130048  }
  0x32   : > { %182 = vxpose.xlu0.b32.start [1/2] (short) (narrow) %v180_v0, 16  ;;  %s233_s19 = sadd.s32 %s351_s14, %s350_s3  ;;  %s177_s23 = scalar_lea.vmem [#allocation5], %s347_s4 }
  0x33   : > { %s236_s18 = sshll.u32 %s177_s23, 4  ;;  %s352_s24 = sshll.u32 %s233_s19, 7  ;;  %s688_s18 = int_to_ptr.vmem [resolvable:$true] %s236_s18 }
  0x34   : > { %s693_s29 = scalar_lea.hbm %s747_s1, %s352_s24  ;;  %s218_s9 = scalar_lea.sflag [#allocation4], %s678_s2 }
  0x35   : > { %s466_s10 = scalar_lea.vmem %s688_s18, 256  ;;  %s567_s20 = smov [#allocation5]  }
  0x36   : > { %183 = vxpose.xlu0.b32.end [2/2] (short) (narrow) %v181_v1, 16  ;;  %p467_p8 = scmp.ne.s32.totalorder %s688_s18, %s466_s10  ;;  %s470_s30 = sshll.u32 %s567_s20, 4  ;;  %s471_s30 = int_to_ptr.vmem [resolvable:$false] %s470_s30 }
  0x37   : > { %s472_s26 = scalar_lea.vmem %s471_s30, 512  ;;  %p473_p4 = scmp.lt.s32.totalorder %s688_s18, %s471_s30 }
  0x38   : > { %p468_p0 = pnand %p467_p8, %p645_p9  ;;  %p474_p5 = scmp.lt.s32.totalorder %s472_s26, %s466_s10 }
  0x3a   : > { %p469_p2 = pneg %p468_p0  ;;  %p475_p3 = por %p474_p5, %p473_p4 }
  0x3c   : > { %p476_p6 = pnand %p475_p3, %p469_p2 }
  0xae   : > { %v198_v2 = vpop.trf.xlu0 }
  0xaf   : > { %215 = vst.msk [vmem:[%s177_s23] sm:$0xff] %vm214_vm0, %v198_v2 }
  0xb2   : > { %v199_v3 = vpop.trf.xlu0 }
  0xb3   : > { %216 = vst.msk [vmem:[%s177_s23 + $0x8] sm:$0xff] %vm214_vm0, %v199_v3 }
  0xb4   : > { %479 = shalt.err (!%p476_p6)
}
  0xb5   : > { %s480_s4 = scalar_lea.hbm %s693_s29, 256  ;;  %s484_s3 = scalar_lea.hbm %s747_s1, 2048 }
  0xb6   : > { %p481_p7 = scmp.ne.s32.totalorder %s693_s29, %s480_s4  ;;  %p485_p13 = scmp.lt.s32.totalorder %s693_s29, %s747_s1 }
  0xb7   : > { %p486_p1 = scmp.lt.s32.totalorder %s484_s3, %s480_s4 }
  0xb8   : > { %p482_p10 = pnand %p481_p7, %p645_p9 }
  0xb9   : > { %p487_p8 = por %p486_p1, %p485_p13 }
  0xba   : > { %p483_p11 = pneg %p482_p10 }
  0xbc   : > { %p488_p0 = pnand %p487_p8, %p483_p11 }
  0xbe   : > { %491 = shalt.err (!%p488_p0)
}
  0xbf   : > { %s568_s23 = smov 128   ;;  %s569_s24 = smov 8  }
  0xc0   : > { %357 = dma.vmem_to_hbm [thread:$0]  (%p645_p9), %s688_s18, 256, %s693_s29, %s218_s9, %s568_s23, %s568_s23, %s569_s24  }
  0xc1 PF: > { %p368_p2 = scmp.ge.s32.totalorder %s562_s13, 2  ;;  %s251_s21 = sand.u32 1, %s534_s6  }
  0xc2   : > { %s252_s28 = scalar_lea.sflag [#allocation4], %s251_s21 }
  0xc3   : > { %p364_p4 = pnand %p368_p2, %p651_p12 }
  0xc5   : > { %p365_p5 = pneg %p364_p4 }
  0xc7   : > { %529 = dma.done.wait (%p365_p5), %s252_s28, 256  }
  0xc8   : > { %531 = vsyncadd (%p365_p5), %s252_s28, 4294967040  ;;  %s17_s13 = sadd.s32 1, %s562_s13   ;;  %s753_s6 = smov %s538_s7 }
  0xc9   : > { %p14_p3 = scmp.ge.s32.totalorder %s17_s13, 10   ;;  %s754_s7 = smov %s542_s8 }
  0xca   : > { %s755_s8 = smov %s658_s27  ;;  %s756_s9 = smov %s554_s11 }
  0xcb   : > { %s757_s10 = smov %s558_s12  ;;  %s758_s11 = smov %s761_s16 }
  0xcc   : > { %s759_s12 = smov %s765_s17  ;;  %16 = sbr.rel (!%p14_p3) target bundleno = 7 (0x7), region = 69 }
  0xd1   :  { %257 = vsyncpa [#allocation3], 1 }
  0xd2   :  { %259 = vsyncpa [#allocation3 + $0x1], 1 }
  0xd3   :  { %260 = vsyncpa [#allocation4], 1 }
  0xd4   :  { %262 = vsyncpa [#allocation4 + $0x1], 1 }

</bundles_post_ra>
